<compile_context>
chip_gen: v5e
topology: v5e:2x2
jax: 0.10.0
libtpu: 0.0.40
codegen_flags: <defaults>
</compile_context>

<pallas_src>
import math
import functools

import jax
import jax.numpy as jnp
from jax import lax
from jax.experimental import pallas as pl
from jax.experimental.pallas import tpu as pltpu

NEG_MIN = float(jnp.finfo(jnp.float32).min)


def _vmem_limit_bytes():
    # Per-generation VMEM budget: ~3/4 of physical (v5e/v6e 128 MiB -> 96 MiB,
    # v7x 64 MiB -> 48 MiB), capped to leave compiler headroom.
    try:
        cap = pltpu.get_tpu_info().vmem_capacity_bytes
    except Exception:
        cap = 64 * 1024 * 1024
    return min(int(cap * 3 // 4), 100 * 1024 * 1024)


VMEM_LIMIT = _vmem_limit_bytes()


def _pick_tile(dim, target, unit):
    """Largest multiple of `unit` <= min(dim, target) that divides dim,
    else the full dim (full-extent blocks are always legal)."""
    best, found = dim, False
    t, cap = unit, min(dim, target)
    while t <= cap:
        if dim % t == 0:
            best, found = t, True
        t += unit
    return best if found else dim


# ----------------------------------------------------------------------------
# Tiled linear: y = x @ w.T  with torch-layout weight w: (out_features, in)
# ----------------------------------------------------------------------------
def _matmul_kernel(x_ref, w_ref, o_ref, acc_ref):
    @pl.when(pl.program_id(2) == 0)
    def _():
        acc_ref[...] = jnp.zeros_like(acc_ref)

    # x: (tm, tk) bf16, w: (tn, tk) bf16 (torch layout) -> contract dim1 x dim1
    acc_ref[...] += jax.lax.dot_general(
        x_ref[...], w_ref[...], (((1,), (1,)), ((), ())),
        preferred_element_type=jnp.float32)

    @pl.when(pl.program_id(2) == pl.num_programs(2) - 1)
    def _():
        o_ref[...] = acc_ref[...].astype(o_ref.dtype)


def tiled_linear(x, w, *, tm_target=512, tn_target=512, tk_target=2048,
                 out_dtype=jnp.float32):
    """x: (M, K), w: (N, K) torch Linear weight (no bias).  Returns (M, N)."""
    if x.dtype != jnp.bfloat16:
        x = x.astype(jnp.bfloat16)
    if w.dtype != jnp.bfloat16:
        # NOTE: callers should pre-cast weights once (hoisted out of hot path).
        w = w.astype(jnp.bfloat16)
    M, K = x.shape
    N, K2 = w.shape
    assert K == K2
    tm = _pick_tile(M, tm_target, 16)    # bf16 (16,128) sublane packing
    tn = _pick_tile(N, tn_target, 128)
    tk = _pick_tile(K, tk_target, 128)
    grid = (M // tm, N // tn, K // tk)
    return pl.pallas_call(
        _matmul_kernel,
        out_shape=jax.ShapeDtypeStruct((M, N), out_dtype),
        grid=grid,
        in_specs=[pl.BlockSpec((tm, tk), lambda i, j, kk: (i, kk)),
                  pl.BlockSpec((tn, tk), lambda i, j, kk: (j, kk))],
        out_specs=pl.BlockSpec((tm, tn), lambda i, j, kk: (i, j)),
        scratch_shapes=[pltpu.VMEM((tm, tn), jnp.float32)],
        compiler_params=pltpu.CompilerParams(
            dimension_semantics=("parallel", "parallel", "arbitrary"),
            vmem_limit_bytes=VMEM_LIMIT),
    )(x, w)


# ----------------------------------------------------------------------------
# Fused H2O attention: flash-style online softmax + per-head H2O score sums
# ----------------------------------------------------------------------------
def _h2o_attn_kernel(q_ref, k_ref, v_ref, o_ref, scores_ref,
                     m_sc, l_sc, acc_sc, *, tq, tk, seq_len):
    qi = pl.program_id(1)

    # Zero the per-head H2O score accumulator at the first q tile of this head.
    @pl.when(qi == 0)
    def _():
        scores_ref[...] = jnp.zeros_like(scores_ref)

    q = q_ref[...]                         # (TQ, D) bf16, pre-scaled by 1/sqrt(d)
    row0 = qi * tq                         # first query row of this q tile
    q_end = row0 + tq                      # exclusive causal column bound
    n_kv = (q_end + tk - 1) // tk          # causal KV tiles only (tile skipping)

    def mask_tile(s, start):
        row = row0 + lax.broadcasted_iota(jnp.int32, (tq, tk), 0)
        col = start + lax.broadcasted_iota(jnp.int32, (tq, tk), 1)
        return jnp.where(row >= col, s, NEG_MIN)

    def logits(k_tile, start):
        s = lax.dot_general(q, k_tile, (((1,), (1,)), ((), ())),
                            preferred_element_type=jnp.float32)   # (TQ, TK) f32
        # Only tiles that touch the diagonal need the iota mask.
        return lax.cond(start + tk - 1 > row0,
                        lambda t: mask_tile(t, start), lambda t: t, s)

    # ---- Pass 1: flash-style online softmax (intermediates bounded to (TQ,TK))
    m_sc[...] = jnp.full_like(m_sc, NEG_MIN)
    l_sc[...] = jnp.zeros_like(l_sc)
    acc_sc[...] = jnp.zeros_like(acc_sc)

    def online_step(j, carry):
        start = pl.multiple_of(j * tk, tk)
        k_t = k_ref[pl.ds(start, tk), :]                          # (TK, D) bf16
        v_t = v_ref[pl.ds(start, tk), :]                          # (TK, D) bf16
        s = logits(k_t, start)
        m_prev = m_sc[...]
        m_new = jnp.maximum(m_prev, jnp.max(s, axis=-1, keepdims=True))
        alpha = jnp.exp(m_prev - m_new)
        e = jnp.exp(s - m_new)                                    # (TQ, TK) f32
        l_sc[...] = alpha * l_sc[...] + jnp.sum(e, axis=-1, keepdims=True)
        acc_sc[...] = alpha * acc_sc[...] + jnp.dot(
            e.astype(jnp.bfloat16), v_t, preferred_element_type=jnp.float32)
        m_sc[...] = m_new
        return carry

    lax.fori_loop(0, n_kv, online_step, 0)

    # Deferred normalization: exact reciprocal on the tiny (TQ,1) denominator,
    # applied to the (TQ, D) accumulator instead of a (TQ, S) probability tile.
    inv_l = 1.0 / l_sc[...]                                       # (TQ, 1) f32
    o_ref[...] = (acc_sc[...] * inv_l).astype(o_ref.dtype)

    # ---- Pass 2: H2O per-key score sums = column sums of the softmax probs.
    # Statically unrolled over KV tiles so every scores_ref slice offset is
    # static; each tile is an exact-f32 (TQ,1)^T x (TQ,TK) MXU matvec (keeps
    # the heavy-hitter top-k inputs unbiased), runtime-skipped when non-causal.
    m_fin = m_sc[...]
    for j in range(seq_len // tk):
        start = j * tk

        @pl.when(start < q_end)                                   # causal skip
        def _(start=start):
            k_t = k_ref[start:start + tk, :]
            s = logits(k_t, start)
            e = jnp.exp(s - m_fin)                                # unnormalized p
            contrib = lax.dot_general(
                inv_l, e, (((0,), (0,)), ((), ())),
                preferred_element_type=jnp.float32)               # (1, TK) f32
            cur = scores_ref[0, 0:1, start:start + tk]
            scores_ref[0, 0:1, start:start + tk] = cur + contrib


def fused_h2o_attention(q, k, v, num_heads, head_dim, *, tq=None, tk=None):
    """q, k, v: (S, hidden) bf16 packed head layout (head h = cols h*D:(h+1)*D).

    Returns (attn_merged (S, hidden) bf16, scores_sum (num_heads, S) f32)."""
    S, hidden = q.shape
    assert hidden == num_heads * head_dim
    # TODO(synk): head_dim=64 configs need an (S,H,D) layout or padded head_dim.
    assert head_dim % 128 == 0 or num_heads == 1, (
        "head_dim must be a multiple of 128 (or num_heads == 1) for the "
        "lane-dense column-sliced BlockSpecs")
    if q.dtype != jnp.bfloat16:
        q = q.astype(jnp.bfloat16)
    if k.dtype != jnp.bfloat16:
        k = k.astype(jnp.bfloat16)
    if v.dtype != jnp.bfloat16:
        v = v.astype(jnp.bfloat16)

    if tq is None:
        tq = _pick_tile(S, 256, 16)      # bf16 sublane unit; 256 suits v6e MXU
    if tk is None:
        tk = _pick_tile(S, 512, 128)
    assert S % tq == 0 and S % tk == 0
    assert tq % 8 == 0 and tk % 8 == 0

    n_q = S // tq

    q_spec = pl.BlockSpec((tq, head_dim), lambda h, qi: (qi, h))
    kv_spec = pl.BlockSpec((S, head_dim), lambda h, qi: (0, h))   # per-head resident
    out_spec = pl.BlockSpec((tq, head_dim), lambda h, qi: (qi, h))
    score_spec = pl.BlockSpec((1, 1, S), lambda h, qi: (h, 0, 0))  # accumulator

    out, scores = pl.pallas_call(
        functools.partial(_h2o_attn_kernel, tq=tq, tk=tk, seq_len=S),
        out_shape=(jax.ShapeDtypeStruct((S, hidden), jnp.bfloat16),
                   jax.ShapeDtypeStruct((num_heads, 1, S), jnp.float32)),
        grid=(num_heads, n_q),
        in_specs=[q_spec, kv_spec, kv_spec],
        out_specs=(out_spec, score_spec),
        scratch_shapes=[pltpu.VMEM((tq, 1), jnp.float32),          # m
                        pltpu.VMEM((tq, 1), jnp.float32),          # l
                        pltpu.VMEM((tq, head_dim), jnp.float32)],  # acc
        compiler_params=pltpu.CompilerParams(
            # TODO(synk): pltpu.CORE_PARALLEL on the head axis to engage both
            # v7x TensorCores once verified on single-core generations.
            dimension_semantics=("parallel", "arbitrary"),
            vmem_limit_bytes=VMEM_LIMIT),
    )(q, k, v)
    return out, scores[:, 0, :]


# ----------------------------------------------------------------------------
# Plain-JAX glue: rotary embedding + H2O heavy-hitter bookkeeping
# ----------------------------------------------------------------------------
def rotary_cos_sin(seq_len, head_dim, base=10000.0):
    inv_freq = 1.0 / (base ** (jnp.arange(0, head_dim, 2, dtype=jnp.float32)
                               / head_dim))
    t = jnp.arange(seq_len, dtype=jnp.float32)
    freqs = jnp.einsum("i,j->ij", t, inv_freq)            # (S, D/2)
    emb = jnp.concatenate([freqs, freqs], axis=-1)        # (S, D)
    return jnp.cos(emb), jnp.sin(emb)


def rotate_half(x):
    x1, x2 = jnp.split(x, 2, axis=-1)
    return jnp.concatenate([-x2, x1], axis=-1)


def apply_rotary_packed(x, cos, sin, num_heads, head_dim):
    """x: (S, hidden) packed head layout; rotary applied per head, no transpose."""
    S, hidden = x.shape
    xh = x.reshape(S, num_heads, head_dim)
    xh = xh * cos[:, None, :] + rotate_half(xh) * sin[:, None, :]
    return xh.reshape(S, hidden)


def h2o_heavy_hitter_forward(hidden_states, w_qkv, w_o, num_heads,
                             heavy_ratio, recent_ratio, *, tq=None, tk=None):
    """hidden_states: (1, S, hidden).  w_qkv: (3*hidden, hidden) fused torch-layout
    q/k/v weight (pre-cast to bf16), w_o: (hidden, hidden) torch-layout output
    weight (pre-cast to bf16).

    Returns (attn_output (1,S,hidden), attention_masks_next (1,H,1,S+1),
    previous_scores (H,S)) — first forward call of the H2O module."""
    bsz, S, hidden = hidden_states.shape
    assert bsz == 1  # mirrors `assert attn_weights.shape[0] == 1` in the module
    head_dim = hidden // num_heads
    scale = 1.0 / math.sqrt(head_dim)

    x = hidden_states[0]                                   # (S, hidden)

    # Fused QKV projection (single tiled Pallas matmul; torch y = x @ W.T).
    qkv = tiled_linear(x, w_qkv)                           # (S, 3*hidden) f32
    q_all = qkv[:, :hidden]
    k_all = qkv[:, hidden:2 * hidden]
    v_all = qkv[:, 2 * hidden:]

    # Rotary embedding (position_ids = arange(S)), applied in packed layout.
    cos, sin = rotary_cos_sin(S, head_dim)
    q_all = apply_rotary_packed(q_all, cos, sin, num_heads, head_dim)
    k_all = apply_rotary_packed(k_all, cos, sin, num_heads, head_dim)

    # Fold 1/sqrt(d) into q (f32) and cast attention inputs to bf16 once.
    # TODO(synk): fuse slice+rotary+scale+cast into the attention kernel
    # (pltpu.roll on q/k tiles with cos/sin blocks) to drop these HBM passes.
    q_bf = (q_all * scale).astype(jnp.bfloat16)
    k_bf = k_all.astype(jnp.bfloat16)
    v_bf = v_all.astype(jnp.bfloat16)

    # Fused flash-style attention + per-head accumulated H2O score sum.
    attn_merged, current_scores_sum = fused_h2o_attention(
        q_bf, k_bf, v_bf, num_heads, head_dim, tq=tq, tk=tk)

    # ---- H2O heavy-hitter cache-budget bookkeeping (first forward call) ----
    previous_scores = current_scores_sum                   # (H, S)
    heavy_budget = int(heavy_ratio * S)
    recent_budget = int(recent_ratio * S)
    cache_budget = heavy_budget + recent_budget

    attn_mask = jnp.ones((num_heads, S + 1), dtype=jnp.float32)
    if S > cache_budget:
        if recent_budget != 0:
            attn_mask = attn_mask.at[:, :-recent_budget].set(0.0)
            selected_set = previous_scores[:, :-recent_budget]
        else:
            attn_mask = jnp.zeros_like(attn_mask)
            selected_set = previous_scores
        if heavy_budget != 0:
            # TODO(synk): top-k + scatter are data-dependent and tiny; kept in
            # plain JAX rather than faking a Pallas equivalent.
            _, keep_topk = jax.lax.top_k(selected_set, heavy_budget)
            attn_mask = attn_mask.at[
                jnp.arange(num_heads)[:, None], keep_topk].set(1.0)

    attention_masks_next = attn_mask[None, :, None, :]     # (1, H, 1, S+1)
    score_mask = attn_mask[:, :-1]
    # NOTE: matches the torch quirk — with recent_budget == 0 the slice [-0:]
    # covers the whole row (same behaviour as the reference module).
    score_mask = score_mask.at[:, -recent_budget:].set(1.0)
    previous_scores = previous_scores * score_mask

    # Output projection (attn_merged is the merged (S, hidden) bf16 slab).
    attn_output = tiled_linear(attn_merged, w_o)[None]     # (1, S, hidden) f32

    return attn_output, attention_masks_next, previous_scores


# ----------------------------------------------------------------------------
# Plain-JAX reference (same bf16-input / f32-accum matmul recipe) for checking
# ----------------------------------------------------------------------------
def _reference_attention(x, w_qkv, w_o, num_heads, head_dim):
    S, hidden = x.shape
    scale = 1.0 / math.sqrt(head_dim)
    qkv = jnp.dot(x.astype(jnp.bfloat16), w_qkv.astype(jnp.bfloat16).T,
                  preferred_element_type=jnp.float32)
    q_all, k_all, v_all = (qkv[:, :hidden], qkv[:, hidden:2 * hidden],
                           qkv[:, 2 * hidden:])
    cos, sin = rotary_cos_sin(S, head_dim)
    q_all = apply_rotary_packed(q_all, cos, sin, num_heads, head_dim) * scale
    k_all = apply_rotary_packed(k_all, cos, sin, num_heads, head_dim)

    def heads(t):
        return t.reshape(S, num_heads, head_dim).transpose(1, 0, 2)

    q, k, v = heads(q_all), heads(k_all), heads(v_all)
    s = jnp.einsum("hqd,hkd->hqk", q.astype(jnp.bfloat16),
                   k.astype(jnp.bfloat16),
                   preferred_element_type=jnp.float32)
    causal = jnp.tril(jnp.ones((S, S), dtype=bool))
    s = jnp.where(causal[None], s, NEG_MIN)
    p = jax.nn.softmax(s, axis=-1)
    scores = p.sum(axis=1)                                  # (H, S)
    out = jnp.einsum("hqk,hkd->hqd", p.astype(jnp.bfloat16),
                     v.astype(jnp.bfloat16),
                     preferred_element_type=jnp.float32)
    merged = out.transpose(1, 0, 2).reshape(S, hidden)
    y = jnp.dot(merged.astype(jnp.bfloat16), w_o.astype(jnp.bfloat16).T,
                preferred_element_type=jnp.float32)
    return y, scores


# ----------------------------------------------------------------------------
# Main
# ----------------------------------------------------------------------------
if __name__ == "__main__":
    # Small config consistent with the module (head_dim kept lane-aligned=128).
    bsz, seq_len, hidden_size, num_heads = 1, 32, 256, 2
    heavy_ratio, recent_ratio = 0.25, 0.25
    head_dim = hidden_size // num_heads

    key = jax.random.PRNGKey(0)
    k0, k1, k2, k3, k4 = jax.random.split(key, 5)
    wscale = 0.05
    # nn.Linear weights stored torch-style: (out_features, in_features)
    wq = wscale * jax.random.normal(k0, (hidden_size, hidden_size), jnp.float32)
    wk = wscale * jax.random.normal(k1, (hidden_size, hidden_size), jnp.float32)
    wv = wscale * jax.random.normal(k2, (hidden_size, hidden_size), jnp.float32)
    wo = wscale * jax.random.normal(k3, (hidden_size, hidden_size), jnp.float32)
    hidden_states = jax.random.normal(k4, (bsz, seq_len, hidden_size),
                                      jnp.float32)

    # Fuse q/k/v weights and hoist the bf16 weight casts out of the hot path.
    w_qkv = jnp.concatenate([wq, wk, wv], axis=0).astype(jnp.bfloat16)
    w_o = wo.astype(jnp.bfloat16)

    # tq=tk=16 exercises multiple q tiles, multiple KV tiles, the causal
    # KV-tile skip, and the diagonal-only mask path at this small S.
    attn_output, attn_masks_next, prev_scores = h2o_heavy_hitter_forward(
        hidden_states, w_qkv, w_o, num_heads, heavy_ratio, recent_ratio,
        tq=16, tk=16)

    jax.block_until_ready(attn_output)
    jax.block_until_ready(attn_masks_next)
    jax.block_until_ready(prev_scores)

    assert attn_output.shape == (bsz, seq_len, hidden_size)
    assert attn_masks_next.shape == (1, num_heads, 1, seq_len + 1)
    assert prev_scores.shape == (num_heads, seq_len)
    assert bool(jnp.all(jnp.isfinite(attn_output)))
    assert bool(jnp.all(jnp.isfinite(prev_scores)))

    # Numerical check against a plain-JAX reference with the same
    # bf16-input / f32-accumulation recipe.
    ref_out, ref_scores = _reference_attention(hidden_states[0], w_qkv, w_o,
                                               num_heads, head_dim)
    assert bool(jnp.allclose(attn_output[0], ref_out, atol=3e-2, rtol=3e-2)), \
        "attention output mismatch vs reference"

    # Check the H2O score path: apply the kernel-selected mask to the reference
    # scores (avoids top-k tie flakiness) and compare against previous_scores.
    recent_budget = int(recent_ratio * seq_len)
    attn_mask_k = attn_masks_next[0, :, 0, :]               # (H, S+1)
    score_mask_k = attn_mask_k[:, :-1]
    score_mask_k = score_mask_k.at[:, -recent_budget:].set(1.0)
    ref_prev = ref_scores * score_mask_k
    assert bool(jnp.allclose(prev_scores, ref_prev, atol=3e-2, rtol=3e-2)), \
        "H2O score-sum mismatch vs reference"

    print("KERNEL_OK")
</pallas_src>

<mosaic_0001>
module attributes {stable_mosaic.version = 11 : i64} {
  func.func @_matmul_kernel(%arg0: i32, %arg1: i32, %arg2: i32, %arg3: memref<32x256xbf16, #tpu.memory_space<vmem>>, %arg4: memref<384x256xbf16, #tpu.memory_space<vmem>>, %arg5: memref<32x384xf32, #tpu.memory_space<vmem>>, %arg6: memref<32x384xf32, #tpu.memory_space<vmem>>) attributes {dimension_semantics = [#tpu.dimension_semantics<parallel>, #tpu.dimension_semantics<parallel>, #tpu.dimension_semantics<arbitrary>], iteration_bounds = array<i64: 1, 2, 1>, scalar_prefetch = 0 : i64, scratch_operands = 1 : i64, tpu.core_type = #tpu.core_type<tc>, window_params = [{transform_indices = @transform_0, window_bounds = array<i64: 32, 256>}, {transform_indices = @transform_1, window_bounds = array<i64: 384, 256>}, {transform_indices = @transform_2, window_bounds = array<i64: 32, 384>}]} {
    %c0_i32 = arith.constant 0 : i32
    %0 = arith.cmpi eq, %arg2, %c0_i32 : i32
    %1 = arith.extui %0 : i1 to i32
    %c0_i32_0 = arith.constant 0 : i32
    %2 = arith.cmpi ne, %1, %c0_i32_0 : i32
    scf.if %2 {
      %cst_10 = arith.constant 0.000000e+00 : f32
      %12 = vector.broadcast %cst_10 : f32 to vector<32x384xf32>
      %c0_11 = arith.constant 0 : index
      %c0_12 = arith.constant 0 : index
      %13 = vector.load %arg6[%c0_11, %c0_12] : memref<32x384xf32, #tpu.memory_space<vmem>>, vector<32x384xf32>
      tpu.vector_store %arg6[%c0_11, %c0_12], %12 {strides = array<i32>} : memref<32x384xf32, #tpu.memory_space<vmem>>, vector<32x384xf32>,
    } else {
    }
    %c0 = arith.constant 0 : index
    %c0_1 = arith.constant 0 : index
    %3 = vector.load %arg6[%c0, %c0_1] : memref<32x384xf32, #tpu.memory_space<vmem>>, vector<32x384xf32>
    %c0_2 = arith.constant 0 : index
    %c0_3 = arith.constant 0 : index
    %4 = vector.load %arg3[%c0_2, %c0_3] : memref<32x256xbf16, #tpu.memory_space<vmem>>, vector<32x256xbf16>
    %c0_4 = arith.constant 0 : index
    %c0_5 = arith.constant 0 : index
    %5 = vector.load %arg4[%c0_4, %c0_5] : memref<384x256xbf16, #tpu.memory_space<vmem>>, vector<384x256xbf16>
    %cst = arith.constant dense<0.000000e+00> : vector<32x384xf32>
    %6 = tpu.matmul %4, %5, %cst {dimension_numbers = #tpu.dot_dimension_numbers<[1], [1], [0], [0], [0, 0, 1, 0], [], []>} : vector<32x256xbf16>, vector<384x256xbf16>, vector<32x384xf32> -> vector<32x384xf32>
    %7 = arith.addf %3, %6 : vector<32x384xf32>
    %c0_6 = arith.constant 0 : index
    %c0_7 = arith.constant 0 : index
    %8 = vector.load %arg6[%c0_6, %c0_7] : memref<32x384xf32, #tpu.memory_space<vmem>>, vector<32x384xf32>
    tpu.vector_store %arg6[%c0_6, %c0_7], %7 {strides = array<i32>} : memref<32x384xf32, #tpu.memory_space<vmem>>, vector<32x384xf32>,
    %c0_i32_8 = arith.constant 0 : i32
    %9 = arith.cmpi eq, %arg2, %c0_i32_8 : i32
    %10 = arith.extui %9 : i1 to i32
    %c0_i32_9 = arith.constant 0 : i32
    %11 = arith.cmpi ne, %10, %c0_i32_9 : i32
    scf.if %11 {
      %c0_10 = arith.constant 0 : index
      %c0_11 = arith.constant 0 : index
      %12 = vector.load %arg6[%c0_10, %c0_11] : memref<32x384xf32, #tpu.memory_space<vmem>>, vector<32x384xf32>
      %c0_12 = arith.constant 0 : index
      %c0_13 = arith.constant 0 : index
      %13 = vector.load %arg5[%c0_12, %c0_13] : memref<32x384xf32, #tpu.memory_space<vmem>>, vector<32x384xf32>
      tpu.vector_store %arg5[%c0_12, %c0_13], %12 {strides = array<i32>} : memref<32x384xf32, #tpu.memory_space<vmem>>, vector<32x384xf32>,
    } else {
    }
    return
  }
  func.func @transform_0(%arg0: i32, %arg1: i32, %arg2: i32) -> (i32, i32) {
    %c0_i32 = arith.constant 0 : i32
    return %arg0, %arg2 : i32, i32
  }
  func.func @transform_1(%arg0: i32, %arg1: i32, %arg2: i32) -> (i32, i32) {
    %c0_i32 = arith.constant 0 : i32
    return %arg1, %arg2 : i32, i32
  }
  func.func @transform_2(%arg0: i32, %arg1: i32, %arg2: i32) -> (i32, i32) {
    %c0_i32 = arith.constant 0 : i32
    return %arg0, %arg1 : i32, i32
  }
}

</mosaic_0001>

<bundles_post_ra>
// kernel: tpu_custom_call.1
= control target key start
LH: loop header
LB: loop body
LE: loop exit
PB: predicated region body
PF: predicated region fallthrough
CT: control target
= control target key end

     0   :  { %7 = vsyncpa [#allocation4], 0  ;;  %s1672_s0 = inlined_call_operand.hbm [shape: bf16[32,256], index: 0, kind: input, shape index: {}]   ;;  %s1673_s1 = inlined_call_operand.hbm [shape: bf16[768,256], index: 1, kind: input, shape index: {}]   ;;  %s1674_s2 = inlined_call_operand.hbm [shape: f32[32,768], index: 2, kind: output, shape index: {}]  }
   0x1   :  { %8 = vsyncpa [#allocation7], 0 }
   0x2   :  { %10 = vsyncpa [#allocation7 + $0x1], 0 }
   0x3   :  { %11 = vsyncpa [#allocation5], 0 }
   0x4   :  { %13 = vsyncpa [#allocation5 + $0x1], 0  ;;  %s1399_s9 = smov 0   ;;  %s1401_s10 = smov 0  }
   0x5   :  { %s1403_s11 = smov 0   ;;  %s1405_s12 = smov 0  }
   0x6   :  { %s1407_s13 = smov 0   ;;  %s1409_s14 = smov 0  }
   0x7 LB: > { %s857_s15 = sadd.s32 4294967295, %s1376_s14   ;;  %s858_s16 = sadd.s32 4294967294, %s1376_s14   ;;  %s1376_s14 = sphi %s1409_s14, %s19_s14   ;;  %s1372_s13 = sphi %s1407_s13, %s1685_s13   ;;  %s1368_s12 = sphi %s1405_s12, %s1684_s12   ;;  %s1364_s11 = sphi %s1403_s11, %s1683_s11   ;;  %s1360_s10 = sphi %s1401_s10, %s1682_s10   ;;  %s1356_s9 = sphi %s1399_s9, %s1681_s9  }
   0x8   : > { %p88_p0 = scmp.ne.s32.totalorder %s1360_s10, %s1356_s9  ;;  %p1433_p1 = scmp.eq.s32.totalorder %s857_s15, 0 }
   0x9   : > { %p1437_p2 = scmp.eq.s32.totalorder %s857_s15, 1  ;;  %p120_p3 = scmp.eq.s32.totalorder %s858_s16, 1 }
   0xa   : > { %p1443_p4 = por %p1433_p1, %p88_p0  ;;  %p859_p5 = scmp.ge.s32.totalorder %s1376_s14, 1 }
   0xb   : > { %p1448_p6 = por %p120_p3, %p88_p0  ;;  %p127_p7 = scmp.lt.s32.totalorder %s1376_s14, 3 }
   0xc   : > { %s144_s23 = sshll.u32 %s1672_s0, 4  ;;  %s1378_s25 = smov [#allocation3]   ;;  %s145_s23 = int_to_ptr.hbm [resolvable:$true] %s144_s23 }
   0xd   : > { %p1456_p8 = pnand %p859_p5, %p127_p7  ;;  %s146_s26 = sshll.u32 %s1378_s25, 4  ;;  %s147_s26 = int_to_ptr.vmem [resolvable:$true] %s146_s26 }
   0xe   : > { %p861_p11 = scmp.ge.s32.totalorder %s1376_s14, 2  ;;  %s1379_s27 = smov 128  }
   0xf   : > { %p1160_p9 = pneg %p1456_p8  ;;  %s1380_s28 = smov 8  }
  0x10   : > { %s34_s29 = sadd.s32 1, %s1372_s13  ;;  %s75_s30 = sadd.s32 1, %s1364_s11 }
  0x11   : > { %p1161_p10 = pnand %p1160_p9, %p1433_p1  ;;  %p36_p12 = scmp.ge.s32.totalorder %s34_s29, 2 }
  0x12   : > { %p82_p13 = scmp.ne.s32.totalorder %s1364_s11, %s1360_s10  ;;  %p83_p0 = scmp.eq.s32.totalorder %s1376_s14, 0 }
  0x13   : > { %1163 = dma.hbm_to_vmem [thread:$0]  (!%p1161_p10), %s145_s23, 512, %s147_s26, [#allocation4], %s1379_s27, %s1379_s27, %s1380_s28  }
  0x14   : > { %s1687_s29 = smov (%p36_p12, %s34_s29), 0  ;;  %p84_p3 = por %p83_p0, %p82_p13 }
  0x15   : > { %p1477_p5 = por %p1437_p2, %p82_p13  ;;  %s70_s4 = ssub.s32 %s1372_s13, %s1687_s29 }
  0x16   : > { %p1173_p7 = scmp.lt.s32.totalorder %s1376_s14, 2  ;;  %p73_p9 = scmp.eq.s32.totalorder %s70_s4, 0 }
  0x17   : > { %s160_s5 = sand.u32 1, %s1364_s11   ;;  %s1132_s8 = smul.u32 384, %s1372_s13 }
  0x18   : > { %s1149_s6 = smul.u32 384, %s160_s5  ;;  %p1165_p10 = pnand %p1173_p7, %p84_p3 }
  0x19   : > { %s1486_s7 = scalar_select %p73_p9, %s1364_s11, %s75_s30  }
  0x1a   : > { %s164_s15 = scalar_lea.vmem [#allocation6], %s1149_s6  ;;  %s172_s23 = scalar_lea.hbm %s1673_s1, %s1132_s8 }
  0x1b   : > { %s175_s16 = sshll.u32 %s164_s15, 4  ;;  %s173_s18 = sshll.u32 %s172_s23, 4  ;;  %s176_s16 = int_to_ptr.vmem [resolvable:$true] %s175_s16  ;;  %s174_s18 = int_to_ptr.hbm [resolvable:$true] %s173_s18 }
  0x1c   : > { %s161_s25 = scalar_lea.sflag [#allocation7], %s160_s5  ;;  %187 = sbr.rel (%p1456_p8) target bundleno = 318 (0x13e), region = 28 }
  0x1d   : > { %1167 = dma.hbm_to_vmem [thread:$0]  (!%p1165_p10), %s174_s18, 6144, %s176_s16, %s161_s25, %s1379_s27, %s1379_s27, %s1380_s28  }
  0x21   : > { %1343 = dma.done.wait (%p1433_p1), [#allocation4], 512  }
  0x22   : > { %1345 = vsyncadd (%p1433_p1), [#allocation4], 4294966784  ;;  %s1502_s26 = sand.u32 1, %s1360_s10  }
  0x23   : > { %s1150_s30 = smul.u32 384, %s1502_s26  ;;  %s195_s4 = scalar_lea.sflag [#allocation7], %s1502_s26 }
  0x25   : > { %s1506_s5 = scalar_lea.vmem [#allocation6], %s1150_s30 }
  0x26   : > { %1347 = dma.done.wait (%p1443_p4), %s195_s4, 6144  }
  0x27   : > { %1349 = vsyncadd (%p1443_p4), %s195_s4, 4294961152  ;;  %v940_v0 = vld [vmem:[%s1506_s5 + $0x70] sm:$0xf]  ;;  %v1098_v1 = vld [vmem:[%s1506_s5 + $0x74] sm:$0xf0]  ;;  %s1151_s17 = smul.u32 96, %s1502_s26 }
  0x28   : > { %v1097_v2 = vld [vmem:[%s1506_s5 + $0x74] sm:$0xf]  ;;  %v941_v3 = vor.u32 %v1098_v1, %v940_v0  ;;  %v942_v4 = vld [vmem:[%s1506_s5 + $0x78] sm:$0xf0]  ;;  %v1004_v5 = vld [vmem:[%s1506_s5 + $0xf0] sm:$0xf] }
  0x29   : > { %v1114_v6 = vld [vmem:[%s1506_s5 + $0xf4] sm:$0xf0]  ;;  %v945_v7 = vor.u32 %v1097_v2, %v942_v4  ;;  %v1113_v9 = vld [vmem:[%s1506_s5 + $0xf4] sm:$0xf]  ;;  %v1006_v10 = vld [vmem:[%s1506_s5 + $0xf8] sm:$0xf0] }
  0x2a   : > { %v1005_v8 = vor.u32 %v1114_v6, %v1004_v5  ;;  %566 = vmatpush.bf16.xpose.msra.mxu0 %v941_v3  ;;  %v1009_v11 = vor.u32 %v1113_v9, %v1006_v10  ;;  %v932_v12 = vld [vmem:[%s1506_s5 + $0x60] sm:$0xf]  ;;  %v1096_v13 = vld [vmem:[%s1506_s5 + $0x64] sm:$0xf0]  ;;  %v1095_v14 = vld [vmem:[%s1506_s5 + $0x64] sm:$0xf] }
  0x2b   : > { %585 = vmatpush.bf16.xpose.msra.mxu1 %v945_v7  ;;  %v934_v15 = vld [vmem:[%s1506_s5 + $0x68] sm:$0xf0]  ;;  %v996_v16 = vld [vmem:[%s1506_s5 + $0xe0] sm:$0xf]  ;;  %v1112_v17 = vld [vmem:[%s1506_s5 + $0xe4] sm:$0xf0]  ;;  %v933_v20 = vor.u32 %v1096_v13, %v932_v12 }
  0x2c   : > { %604 = vmatpush.bf16.xpose.msra.mxu2 %v1005_v8  ;;  %623 = vmatpush.bf16.xpose.msra.mxu3 %v1009_v11  ;;  %v1111_v18 = vld [vmem:[%s1506_s5 + $0xe4] sm:$0xf]  ;;  %v998_v19 = vld [vmem:[%s1506_s5 + $0xe8] sm:$0xf0]  ;;  %v937_v21 = vor.u32 %v1095_v14, %v934_v15  ;;  %v997_v22 = vor.u32 %v1112_v17, %v996_v16  ;;  %v924_v24 = vld [vmem:[%s1506_s5 + $0x50] sm:$0xf] }
  0x2d   : > { %v1001_v23 = vor.u32 %v1111_v18, %v998_v19  ;;  %v1094_v25 = vld [vmem:[%s1506_s5 + $0x54] sm:$0xf0]  ;;  %v1093_v26 = vld [vmem:[%s1506_s5 + $0x54] sm:$0xf]  ;;  %v926_v27 = vld [vmem:[%s1506_s5 + $0x58] sm:$0xf0] }
  0x2e   : > { %v988_v28 = vld [vmem:[%s1506_s5 + $0xd0] sm:$0xf]  ;;  %v1110_v29 = vld [vmem:[%s1506_s5 + $0xd4] sm:$0xf0]  ;;  %v1109_v30 = vld [vmem:[%s1506_s5 + $0xd4] sm:$0xf]  ;;  %v925_v32 = vor.u32 %v1094_v25, %v924_v24  ;;  %v929_v33 = vor.u32 %v1093_v26, %v926_v27 }
  0x2f   : > { %v990_v31 = vld [vmem:[%s1506_s5 + $0xd8] sm:$0xf0]  ;;  %v989_v34 = vor.u32 %v1110_v29, %v988_v28  ;;  %v916_v36 = vld [vmem:[%s1506_s5 + $0x40] sm:$0xf]  ;;  %v1092_v37 = vld [vmem:[%s1506_s5 + $0x44] sm:$0xf0] }
  0x30   : > { %v993_v35 = vor.u32 %v1109_v30, %v990_v31  ;;  %v1091_v38 = vld [vmem:[%s1506_s5 + $0x44] sm:$0xf]  ;;  %v918_v39 = vld [vmem:[%s1506_s5 + $0x48] sm:$0xf0]  ;;  %v980_v40 = vld [vmem:[%s1506_s5 + $0xc0] sm:$0xf]  ;;  %v917_v44 = vor.u32 %v1092_v37, %v916_v36 }
  0x31   : > { %v1108_v41 = vld [vmem:[%s1506_s5 + $0xc4] sm:$0xf0]  ;;  %v1107_v42 = vld [vmem:[%s1506_s5 + $0xc4] sm:$0xf]  ;;  %v982_v43 = vld [vmem:[%s1506_s5 + $0xc8] sm:$0xf0]  ;;  %v921_v45 = vor.u32 %v1091_v38, %v918_v39 }
  0x32   : > { %567 = vmatpush.bf16.xpose.msra.mxu0 %v933_v20  ;;  %v981_v46 = vor.u32 %v1108_v41, %v980_v40  ;;  %v985_v47 = vor.u32 %v1107_v42, %v982_v43  ;;  %v908_v48 = vld [vmem:[%s1506_s5 + $0x30] sm:$0xf]  ;;  %v1090_v49 = vld [vmem:[%s1506_s5 + $0x34] sm:$0xf0]  ;;  %v1089_v50 = vld [vmem:[%s1506_s5 + $0x34] sm:$0xf] }
  0x33   : > { %586 = vmatpush.bf16.xpose.msra.mxu1 %v937_v21  ;;  %v910_v51 = vld [vmem:[%s1506_s5 + $0x38] sm:$0xf0]  ;;  %v972_v52 = vld [vmem:[%s1506_s5 + $0xb0] sm:$0xf]  ;;  %v1106_v53 = vld [vmem:[%s1506_s5 + $0xb4] sm:$0xf0]  ;;  %v909_v56 = vor.u32 %v1090_v49, %v908_v48 }
  0x34   : > { %605 = vmatpush.bf16.xpose.msra.mxu2 %v997_v22  ;;  %624 = vmatpush.bf16.xpose.msra.mxu3 %v1001_v23  ;;  %v1105_v54 = vld [vmem:[%s1506_s5 + $0xb4] sm:$0xf]  ;;  %v974_v55 = vld [vmem:[%s1506_s5 + $0xb8] sm:$0xf0]  ;;  %v913_v57 = vor.u32 %v1089_v50, %v910_v51  ;;  %v973_v58 = vor.u32 %v1106_v53, %v972_v52  ;;  %v900_v60 = vld [vmem:[%s1506_s5 + $0x20] sm:$0xf] }
  0x35   : > { %v977_v59 = vor.u32 %v1105_v54, %v974_v55  ;;  %v1088_v61 = vld [vmem:[%s1506_s5 + $0x24] sm:$0xf0]  ;;  %v1087_v62 = vld [vmem:[%s1506_s5 + $0x24] sm:$0xf]  ;;  %v902_v63 = vld [vmem:[%s1506_s5 + $0x28] sm:$0xf0] }
  0x36   : > { %v964_v0 = vld [vmem:[%s1506_s5 + $0xa0] sm:$0xf]  ;;  %v1104_v1 = vld [vmem:[%s1506_s5 + $0xa4] sm:$0xf0]  ;;  %v1103_v2 = vld [vmem:[%s1506_s5 + $0xa4] sm:$0xf]  ;;  %v901_v4 = vor.u32 %v1088_v61, %v900_v60  ;;  %v905_v5 = vor.u32 %v1087_v62, %v902_v63 }
  0x37   : > { %v966_v3 = vld [vmem:[%s1506_s5 + $0xa8] sm:$0xf0]  ;;  %v965_v6 = vor.u32 %v1104_v1, %v964_v0  ;;  %v892_v8 = vld [vmem:[%s1506_s5 + $0x10] sm:$0xf]  ;;  %v1086_v9 = vld [vmem:[%s1506_s5 + $0x14] sm:$0xf0] }
  0x38   : > { %v969_v7 = vor.u32 %v1103_v2, %v966_v3  ;;  %v1085_v10 = vld [vmem:[%s1506_s5 + $0x14] sm:$0xf]  ;;  %v894_v11 = vld [vmem:[%s1506_s5 + $0x18] sm:$0xf0]  ;;  %v956_v12 = vld [vmem:[%s1506_s5 + $0x90] sm:$0xf]  ;;  %v893_v16 = vor.u32 %v1086_v9, %v892_v8 }
  0x39   : > { %v1102_v13 = vld [vmem:[%s1506_s5 + $0x94] sm:$0xf0]  ;;  %v1101_v14 = vld [vmem:[%s1506_s5 + $0x94] sm:$0xf]  ;;  %v958_v15 = vld [vmem:[%s1506_s5 + $0x98] sm:$0xf0]  ;;  %v897_v17 = vor.u32 %v1085_v10, %v894_v11 }
  0x3a   : > { %568 = vmatpush.bf16.xpose.msra.mxu0 %v925_v32  ;;  %v957_v18 = vor.u32 %v1102_v13, %v956_v12  ;;  %v961_v19 = vor.u32 %v1101_v14, %v958_v15  ;;  %v884_v20 = vld [vmem:[%s1506_s5] sm:$0xf]  ;;  %v1084_v21 = vld [vmem:[%s1506_s5 + $0x4] sm:$0xf0]  ;;  %v1083_v22 = vld [vmem:[%s1506_s5 + $0x4] sm:$0xf] }
  0x3b   : > { %587 = vmatpush.bf16.xpose.msra.mxu1 %v929_v33  ;;  %v886_v23 = vld [vmem:[%s1506_s5 + $0x8] sm:$0xf0]  ;;  %v948_v24 = vld [vmem:[%s1506_s5 + $0x80] sm:$0xf]  ;;  %v1100_v25 = vld [vmem:[%s1506_s5 + $0x84] sm:$0xf0]  ;;  %v885_v30 = vor.u32 %v1084_v21, %v884_v20 }
  0x3c   : > { %606 = vmatpush.bf16.xpose.msra.mxu2 %v989_v34  ;;  %625 = vmatpush.bf16.xpose.msra.mxu3 %v993_v35  ;;  %v1099_v26 = vld [vmem:[%s1506_s5 + $0x84] sm:$0xf]  ;;  %v950_v27 = vld [vmem:[%s1506_s5 + $0x88] sm:$0xf0]  ;;  %v1068_v28 = vld [vmem:[%s1506_s5 + $0x170] sm:$0xf]  ;;  %v889_v33 = vor.u32 %v1083_v22, %v886_v23  ;;  %v949_v34 = vor.u32 %v1100_v25, %v948_v24 }
  0x3d   : > { %v1130_v29 = vld [vmem:[%s1506_s5 + $0x174] sm:$0xf0]  ;;  %v1129_v31 = vld [vmem:[%s1506_s5 + $0x174] sm:$0xf]  ;;  %v1070_v32 = vld [vmem:[%s1506_s5 + $0x178] sm:$0xf0]  ;;  %v953_v35 = vor.u32 %v1099_v26, %v950_v27 }
  0x3e   : > { %v1069_v36 = vor.u32 %v1130_v29, %v1068_v28  ;;  %v1073_v37 = vor.u32 %v1129_v31, %v1070_v32  ;;  %v868_v38 = vld [vmem:[#allocation3] sm:$0xf]  ;;  %v1080_v39 = vld [vmem:[#allocation3 + $0x4] sm:$0xf0]  ;;  %v1079_v40 = vld [vmem:[#allocation3 + $0x4] sm:$0xf] }
  0x3f   : > { %v870_v41 = vld [vmem:[#allocation3 + $0x8] sm:$0xf0]  ;;  %v1060_v42 = vld [vmem:[%s1506_s5 + $0x160] sm:$0xf]  ;;  %v1128_v43 = vld [vmem:[%s1506_s5 + $0x164] sm:$0xf0] }
  0x40   : > { %v1061_v48 = vor.u32 %v1128_v43, %v1060_v42  ;;  %v1052_v50 = vld [vmem:[%s1506_s5 + $0x150] sm:$0xf]  ;;  %v1126_v51 = vld [vmem:[%s1506_s5 + $0x154] sm:$0xf0]  ;;  %v1125_v52 = vld [vmem:[%s1506_s5 + $0x154] sm:$0xf] }
  0x41   : > { %v1054_v53 = vld [vmem:[%s1506_s5 + $0x158] sm:$0xf0]  ;;  %v1053_v54 = vor.u32 %v1126_v51, %v1052_v50  ;;  %v1044_v60 = vld [vmem:[%s1506_s5 + $0x140] sm:$0xf]  ;;  %v1124_v61 = vld [vmem:[%s1506_s5 + $0x144] sm:$0xf0] }
  0x42   : > { %569 = vmatpush.bf16.xpose.msra.mxu0 %v917_v44  ;;  %v1127_v44 = vld [vmem:[%s1506_s5 + $0x164] sm:$0xf]  ;;  %v1057_v55 = vor.u32 %v1125_v52, %v1054_v53  ;;  %v1046_v63 = vld [vmem:[%s1506_s5 + $0x148] sm:$0xf0]  ;;  %v1045_v2 = vor.u32 %v1124_v61, %v1044_v60  ;;  %v1028_v10 = vld [vmem:[%s1506_s5 + $0x120] sm:$0xf] }
  0x43   : > { %588 = vmatpush.bf16.xpose.msra.mxu1 %v921_v45  ;;  %v1062_v45 = vld [vmem:[%s1506_s5 + $0x168] sm:$0xf0]  ;;  %v1123_v62 = vld [vmem:[%s1506_s5 + $0x144] sm:$0xf]  ;;  %v1120_v11 = vld [vmem:[%s1506_s5 + $0x124] sm:$0xf0] }
  0x44   : > { %607 = vmatpush.bf16.xpose.msra.mxu2 %v981_v46  ;;  %626 = vmatpush.bf16.xpose.msra.mxu3 %v985_v47  ;;  %v1584_v46 = vor.u32 %v1080_v39, %v868_v38  ;;  %v1586_v47 = vor.u32 %v1079_v40, %v870_v41  ;;  %v1065_v49 = vor.u32 %v1127_v44, %v1062_v45  ;;  %v1119_v12 = vld [vmem:[%s1506_s5 + $0x124] sm:$0xf]  ;;  %v1030_v13 = vld [vmem:[%s1506_s5 + $0x128] sm:$0xf0]  ;;  %v1012_v22 = vld [vmem:[%s1506_s5 + $0x100] sm:$0xf] }
  0x45   : > { %v1049_v3 = vor.u32 %v1123_v62, %v1046_v63  ;;  %v1029_v14 = vor.u32 %v1120_v11, %v1028_v10  ;;  %v1033_v15 = vor.u32 %v1119_v12, %v1030_v13  ;;  %v1116_v23 = vld [vmem:[%s1506_s5 + $0x104] sm:$0xf0]  ;;  %v1115_v24 = vld [vmem:[%s1506_s5 + $0x104] sm:$0xf]  ;;  %v1014_v25 = vld [vmem:[%s1506_s5 + $0x108] sm:$0xf0] }
  0x46   : > { %v1013_v26 = vor.u32 %v1116_v23, %v1012_v22  ;;  %v1017_v27 = vor.u32 %v1115_v24, %v1014_v25  ;;  %s1619_s19 = scalar_lea.vmem [#allocation8], %s1151_s17  ;;  %s1131_s24 = smul.u32 24, %s1368_s12 }
  0x47   : > { %s747_s8 = sshll.u32 %s1619_s19, 4  ;;  %s732_s12 = scalar_lea.sflag [#allocation5], %s1502_s26  ;;  %s748_s8 = int_to_ptr.vmem [resolvable:$true] %s747_s8 }
  0x48   : > { %s746_s6 = scalar_lea.hbm %s1674_s2, %s1131_s24  ;;  %s1310_s18 = scalar_lea.hbm %s1674_s2, 192 }
  0x49   : > { %s749_s15 = sshll.u32 %s746_s6, 4  ;;  %s750_s15 = int_to_ptr.hbm [resolvable:$true] %s749_s15 }
  0x4a   : > { %570 = vmatpush.bf16.xpose.msra.mxu0 %v909_v56  ;;  %v876_v56 = vld [vmem:[#allocation3 + $0x10] sm:$0xf]  ;;  %s1304_s16 = sshra.s32 %s750_s15, 4  ;;  %s1305_s16 = int_to_ptr.hbm [resolvable:$true] %s1304_s16 }
  0x4b   : > { %589 = vmatpush.bf16.xpose.msra.mxu1 %v913_v57  ;;  %v1082_v57 = vld [vmem:[#allocation3 + $0x14] sm:$0xf0]  ;;  %s1306_s21 = scalar_lea.hbm %s1305_s16, 96  ;;  %p1311_p8 = scmp.lt.s32.totalorder %s1305_s16, %s1674_s2 }
  0x4c   : > { %608 = vmatpush.bf16.xpose.msra.mxu2 %v973_v58  ;;  %627 = vmatpush.bf16.xpose.msra.mxu3 %v977_v59  ;;  %v1081_v58 = vld [vmem:[#allocation3 + $0x14] sm:$0xf]  ;;  %v878_v59 = vld [vmem:[#allocation3 + $0x18] sm:$0xf0]  ;;  %v877_v0 = vor.u32 %v1082_v57, %v876_v56  ;;  %p1307_p1 = scmp.ne.s32.totalorder %s1305_s16, %s1306_s21  ;;  %p1312_p12 = scmp.lt.s32.totalorder %s1310_s18, %s1306_s21 }
  0x4d   : > { %v881_v1 = vor.u32 %v1081_v58, %v878_v59 }
  0x4e   : > { %p1308_p2 = pnand %p1307_p1, %p1477_p5  ;;  %p1313_p13 = por %p1312_p12, %p1311_p8 }
  0x50   : > { %p1309_p4 = pneg %p1308_p2 }
  0x52   : > { %571 = vmatpush.bf16.xpose.msra.mxu0 %v901_v4  ;;  %v1036_v4 = vld [vmem:[%s1506_s5 + $0x130] sm:$0xf]  ;;  %p1314_p0 = pnand %p1313_p13, %p1309_p4 }
  0x53   : > { %590 = vmatpush.bf16.xpose.msra.mxu1 %v905_v5  ;;  %v1122_v5 = vld [vmem:[%s1506_s5 + $0x134] sm:$0xf0] }
  0x54   : > { %609 = vmatpush.bf16.xpose.msra.mxu2 %v965_v6  ;;  %628 = vmatpush.bf16.xpose.msra.mxu3 %v969_v7  ;;  %v1121_v6 = vld [vmem:[%s1506_s5 + $0x134] sm:$0xf]  ;;  %v1038_v7 = vld [vmem:[%s1506_s5 + $0x138] sm:$0xf0]  ;;  %v1037_v8 = vor.u32 %v1122_v5, %v1036_v4 }
  0x55   : > { %v1041_v9 = vor.u32 %v1121_v6, %v1038_v7 }
  0x5a   : > { %572 = vmatpush.bf16.xpose.msra.mxu0 %v893_v16  ;;  %v1020_v16 = vld [vmem:[%s1506_s5 + $0x110] sm:$0xf] }
  0x5b   : > { %591 = vmatpush.bf16.xpose.msra.mxu1 %v897_v17  ;;  %v1118_v17 = vld [vmem:[%s1506_s5 + $0x114] sm:$0xf0] }
  0x5c   : > { %610 = vmatpush.bf16.xpose.msra.mxu2 %v957_v18  ;;  %629 = vmatpush.bf16.xpose.msra.mxu3 %v961_v19  ;;  %v1117_v18 = vld [vmem:[%s1506_s5 + $0x114] sm:$0xf]  ;;  %v1022_v19 = vld [vmem:[%s1506_s5 + $0x118] sm:$0xf0]  ;;  %v1021_v20 = vor.u32 %v1118_v17, %v1020_v16 }
  0x5d   : > { %v1025_v21 = vor.u32 %v1117_v18, %v1022_v19 }
  0x62   : > { %573 = vmatpush.bf16.xpose.msra.mxu0 %v885_v30 }
  0x63   : > { %592 = vmatpush.bf16.xpose.msra.mxu1 %v889_v33 }
  0x64   : > { %611 = vmatpush.bf16.xpose.msra.mxu2 %v949_v34  ;;  %630 = vmatpush.bf16.xpose.msra.mxu3 %v953_v35 }
  0x69   : > { %574 = vmatmul.bf16.vlgmr.msra.gmra.mxu0 %v1584_v46 }
  0x6a   : > { %642 = vmatpush.bf16.xpose.msrb.mxu0 %v1069_v36  ;;  %593 = vmatmul.bf16.vlgmr.msra.gmra.mxu1 %v1586_v47 }
  0x6b   : > { %661 = vmatpush.bf16.xpose.msrb.mxu1 %v1073_v37  ;;  %612 = vmatmul.bf16.vlgmr.msra.gmra.mxu2 %v1584_v46 }
  0x6c   : > { %1133 = vmatpush.bf16.xpose.msrb.mxu2 %v1069_v36  ;;  %1141 = vmatpush.bf16.xpose.msrb.mxu3 %v1073_v37 }
  0x6d   : > { %631 = vmatmul.bf16.vlgmr.msra.gmra.mxu3 %v1586_v47 }
  0x72   : > { %643 = vmatpush.bf16.xpose.msrb.mxu0 %v1061_v48 }
  0x73   : > { %662 = vmatpush.bf16.xpose.msrb.mxu1 %v1065_v49 }
  0x74   : > { %1134 = vmatpush.bf16.xpose.msrb.mxu2 %v1061_v48  ;;  %1142 = vmatpush.bf16.xpose.msrb.mxu3 %v1065_v49 }
  0x79   : > { %579 = vmatmul.bf16.gmra.mxu0 %v877_v0 }
  0x7a   : > { %644 = vmatpush.bf16.xpose.msrb.mxu0 %v1053_v54  ;;  %598 = vmatmul.bf16.gmra.mxu1 %v881_v1 }
  0x7b   : > { %663 = vmatpush.bf16.xpose.msrb.mxu1 %v1057_v55  ;;  %617 = vmatmul.bf16.gmra.mxu2 %v877_v0 }
  0x7c   : > { %1135 = vmatpush.bf16.xpose.msrb.mxu2 %v1053_v54  ;;  %1143 = vmatpush.bf16.xpose.msrb.mxu3 %v1057_v55 }
  0x7d   : > { %636 = vmatmul.bf16.gmra.mxu3 %v881_v1 }
  0x82   : > { %645 = vmatpush.bf16.xpose.msrb.mxu0 %v1045_v2 }
  0x83   : > { %664 = vmatpush.bf16.xpose.msrb.mxu1 %v1049_v3 }
  0x84   : > { %1136 = vmatpush.bf16.xpose.msrb.mxu2 %v1045_v2  ;;  %1144 = vmatpush.bf16.xpose.msrb.mxu3 %v1049_v3 }
  0x8a   : > { %646 = vmatpush.bf16.xpose.msrb.mxu0 %v1037_v8 }
  0x8b   : > { %665 = vmatpush.bf16.xpose.msrb.mxu1 %v1041_v9 }
  0x8c   : > { %1137 = vmatpush.bf16.xpose.msrb.mxu2 %v1037_v8  ;;  %1145 = vmatpush.bf16.xpose.msrb.mxu3 %v1041_v9 }
  0x92   : > { %647 = vmatpush.bf16.xpose.msrb.mxu0 %v1029_v14 }
  0x93   : > { %666 = vmatpush.bf16.xpose.msrb.mxu1 %v1033_v15 }
  0x94   : > { %1138 = vmatpush.bf16.xpose.msrb.mxu2 %v1029_v14  ;;  %1146 = vmatpush.bf16.xpose.msrb.mxu3 %v1033_v15 }
  0x9a   : > { %648 = vmatpush.bf16.xpose.msrb.mxu0 %v1021_v20 }
  0x9b   : > { %667 = vmatpush.bf16.xpose.msrb.mxu1 %v1025_v21 }
  0x9c   : > { %1139 = vmatpush.bf16.xpose.msrb.mxu2 %v1021_v20  ;;  %1147 = vmatpush.bf16.xpose.msrb.mxu3 %v1025_v21 }
  0xa2   : > { %649 = vmatpush.bf16.xpose.msrb.mxu0 %v1013_v26 }
  0xa3   : > { %668 = vmatpush.bf16.xpose.msrb.mxu1 %v1017_v27 }
  0xa4   : > { %1140 = vmatpush.bf16.xpose.msrb.mxu2 %v1013_v26  ;;  %1148 = vmatpush.bf16.xpose.msrb.mxu3 %v1017_v27 }
  0xa9   : > { %650 = vmatmul.bf16.vlgmr.msrb.gmra.mxu0 %v1584_v46 }
  0xaa   : > { %669 = vmatmul.bf16.vlgmr.msrb.gmra.mxu1 %v1586_v47 }
  0xab   : > { %655 = vmatmul.bf16.vlgmr.msrb.gmra.mxu2 %v877_v0  ;;  %674 = vmatmul.bf16.vlgmr.msrb.gmra.mxu3 %v881_v1 }
  0xe6   : > { %v575_v28 = vpop.f32.mrf.mxu0 }
  0xe7   : > { %v594_v29 = vpop.f32.mrf.mxu1 }
  0xe8   : > { %v595_v30 = vadd.f32 %v594_v29, %v575_v28 }
  0xea   : > { %719 = vst [vmem:[%s1619_s19] sm:$0xff] %v595_v30 }
  0xee   : > { %v613_v31 = vpop.f32.mrf.mxu2  ;;  %v577_v33 = vpop.f32.mrf.mxu0 }
  0xef   : > { %v596_v35 = vpop.f32.mrf.mxu1 }
  0xf0   : > { %v632_v32 = vpop.f32.mrf.mxu3  ;;  %v597_v36 = vadd.f32 %v596_v35, %v577_v33 }
  0xf1   : > { %v633_v34 = vadd.f32 %v632_v32, %v613_v31 }
  0xf2   : > { %722 = vst [vmem:[%s1619_s19 + $0x18] sm:$0xff] %v597_v36 }
  0xf3   : > { %720 = vst [vmem:[%s1619_s19 + $0x8] sm:$0xff] %v633_v34 }
  0xf6   : > { %v615_v37 = vpop.f32.mrf.mxu2  ;;  %v580_v39 = vpop.f32.mrf.mxu0 }
  0xf7   : > { %v599_v41 = vpop.f32.mrf.mxu1 }
  0xf8   : > { %v634_v38 = vpop.f32.mrf.mxu3  ;;  %v600_v42 = vadd.f32 %v599_v41, %v580_v39 }
  0xf9   : > { %v635_v40 = vadd.f32 %v634_v38, %v615_v37 }
  0xfa   : > { %725 = vst [vmem:[%s1619_s19 + $0x30] sm:$0xff] %v600_v42 }
  0xfb   : > { %723 = vst [vmem:[%s1619_s19 + $0x20] sm:$0xff] %v635_v40 }
  0xfe   : > { %v618_v43 = vpop.f32.mrf.mxu2  ;;  %v582_v45 = vpop.f32.mrf.mxu0 }
  0xff   : > { %v601_v47 = vpop.f32.mrf.mxu1 }
 0x100   : > { %v637_v44 = vpop.f32.mrf.mxu3  ;;  %v602_v48 = vadd.f32 %v601_v47, %v582_v45 }
 0x101   : > { %v638_v46 = vadd.f32 %v637_v44, %v618_v43 }
 0x102   : > { %728 = vst [vmem:[%s1619_s19 + $0x48] sm:$0xff] %v602_v48 }
 0x103   : > { %726 = vst [vmem:[%s1619_s19 + $0x38] sm:$0xff] %v638_v46 }
 0x106   : > { %v620_v49 = vpop.f32.mrf.mxu2 }
 0x108   : > { %v639_v50 = vpop.f32.mrf.mxu3 }
 0x109   : > { %v640_v51 = vadd.f32 %v639_v50, %v620_v49 }
 0x10b   : > { %729 = vst [vmem:[%s1619_s19 + $0x50] sm:$0xff] %v640_v51 }
 0x126   : > { %v651_v52 = vpop.f32.mrf.mxu0 }
 0x127   : > { %v670_v53 = vpop.f32.mrf.mxu1 }
 0x128   : > { %v671_v54 = vadd.f32 %v670_v53, %v651_v52 }
 0x12a   : > { %721 = vst [vmem:[%s1619_s19 + $0x10] sm:$0xff] %v671_v54 }
 0x12e   : > { %v656_v55 = vpop.f32.mrf.mxu2  ;;  %v675_v56 = vpop.f32.mrf.mxu3 }
 0x12f   : > { %v653_v57 = vpop.f32.mrf.mxu0  ;;  %v676_v58 = vadd.f32 %v675_v56, %v656_v55  ;;  %v672_v59 = vpop.f32.mrf.mxu1 }
 0x130   : > { %v673_v60 = vadd.f32 %v672_v59, %v653_v57 }
 0x131   : > { %727 = vst [vmem:[%s1619_s19 + $0x40] sm:$0xff] %v676_v58 }
 0x132   : > { %724 = vst [vmem:[%s1619_s19 + $0x28] sm:$0xff] %v673_v60 }
 0x136   : > { %v658_v61 = vpop.f32.mrf.mxu2  ;;  %v677_v62 = vpop.f32.mrf.mxu3 }
 0x137   : > { %v678_v63 = vadd.f32 %v677_v62, %v658_v61 }
 0x139   : > { %730 = vst [vmem:[%s1619_s19 + $0x58] sm:$0xff] %v678_v63 }
 0x13a   : > { %1317 = shalt.err (!%p1314_p0)
}
 0x13b   : > { %s1381_s26 = smov 384   ;;  %s1382_s4 = smov 768  }
 0x13c   : > { %s1383_s5 = smov 24  }
 0x13d   : > { %1158 = dma.vmem_to_hbm [thread:$0]  (%p1477_p5), %s748_s8, 1536, %s750_s15, %s732_s12, %s1381_s26, %s1382_s4, %s1383_s5  }
 0x13e PF: > { %s764_s17 = sand.u32 1, %s1356_s9   ;;  %p1169_p3 = pnand %p861_p11, %p1448_p6 }
 0x13f   : > { %s765_s19 = scalar_lea.sflag [#allocation5], %s764_s17 }
 0x140   : > { %p1170_p7 = pneg %p1169_p3 }
 0x142   : > { %1351 = dma.done.wait (%p1170_p7), %s765_s19, 1536  }
 0x143   : > { %1353 = vsyncadd (%p1170_p7), %s765_s19, 4294965760  ;;  %s19_s14 = sadd.s32 1, %s1376_s14   ;;  %s1681_s9 = smov %s1360_s10 }
 0x144   : > { %p16_p9 = scmp.ge.s32.totalorder %s19_s14, 4   ;;  %s1682_s10 = smov %s1364_s11 }
 0x145   : > { %s1683_s11 = smov %s1486_s7  ;;  %s1684_s12 = smov %s1372_s13 }
 0x146   : > { %s1685_s13 = smov %s1687_s29  ;;  %18 = sbr.rel (!%p16_p9) target bundleno = 7 (0x7), region = 87 }
 0x14b   :  { %771 = vsyncpa [#allocation4], 1 }
 0x14c   :  { %773 = vsyncpa [#allocation4 + $0x1], 1 }
 0x14d   :  { %774 = vsyncpa [#allocation7], 1 }
 0x14e   :  { %776 = vsyncpa [#allocation7 + $0x1], 1 }
 0x14f   :  { %777 = vsyncpa [#allocation5], 1 }
 0x150   :  { %779 = vsyncpa [#allocation5 + $0x1], 1 }

</bundles_post_ra>
